<compile_context>
chip_gen: v7x
topology: tpu7x:2x2x1
jax: 0.10.0
libtpu: 0.0.40
codegen_flags: <defaults>
</compile_context>

<pallas_src>
import jax
import jax.numpy as jnp
from jax.experimental import pallas as pl
from jax.experimental.pallas import tpu as pltpu


def _ensemble_critic_kernel(x_ref, w1_ref, w2_ref, w3_ref, o_ref):
    # x_ref:  (B, S+A+1)        augmented input [state, action, 1]
    # w1_ref: (S+A+1, EH_PAD)   W1 folded over ensemble, b1 in last row, carrier lane seeded
    # w2_ref: (EH_PAD, EH_PAD)  block-diagonal W2, b2 in carrier row, carrier passthrough
    # w3_ref: (EH_PAD, EO_PAD)  block-diagonal W3, b3 in carrier row
    # o_ref:  (B, EO_PAD)       lane-dense padded output slab (unmasked store)
    h1 = jnp.maximum(
        jnp.dot(x_ref[...], w1_ref[...], preferred_element_type=jnp.float32), 0.0)
    h2 = jnp.maximum(
        jnp.dot(h1, w2_ref[...], preferred_element_type=jnp.float32), 0.0)
    q = jnp.dot(h2, w3_ref[...], preferred_element_type=jnp.float32)
    o_ref[...] = q.astype(o_ref.dtype)


def ensemble_critic_forward(state, action, fused, ensemble_size, output_size):
    """Pallas implementation of EnsembleCritic.forward.

    state:  (B, S) f32
    action: (B, A) f32
    fused:  dict produced by fuse_params (3 augmented weight slabs)
    returns: (B, ensemble_size, output_size) f32 (matches torch.stack(values, dim=1))
    """
    state = state.astype(jnp.float32)
    action = action.astype(jnp.float32)
    B = state.shape[0]
    EO = ensemble_size * output_size
    EO_PAD = fused["w3"].shape[1]

    # Single layer-1 operand: [state, action, 1].  Tiny (B, S+A+1) slab; one DMA.
    x_aug = jnp.concatenate(
        [state, action, jnp.ones((B, 1), jnp.float32)], axis=-1)

    out = pl.pallas_call(
        _ensemble_critic_kernel,
        out_shape=jax.ShapeDtypeStruct((B, EO_PAD), jnp.float32),
        # Grid-less call: whole arrays live in VMEM, no pipelining machinery.
        in_specs=[pl.BlockSpec(memory_space=pltpu.MemorySpace.VMEM)] * 4,
        out_specs=pl.BlockSpec(memory_space=pltpu.MemorySpace.VMEM),
    )(x_aug, fused["w1"], fused["w2"], fused["w3"])

    # Drop zero padding lanes, then (B, E*O) -> (B, E, O): pure slice + reshape.
    return out[:, :EO].reshape(B, ensemble_size, output_size)


def _round_up(x, m):
    return ((x + m - 1) // m) * m


def _block_diag(w):
    """(E, H, K) stacked per-ensemble weights -> (E*H, E*K) block-diagonal."""
    E, H, K = w.shape
    eye = jnp.eye(E, dtype=w.dtype)
    return jnp.einsum("ehk,ef->ehfk", w, eye).reshape(E * H, E * K)


def fuse_params(params):
    """One-time re-layout: fold ensemble into lanes, fold biases into the matmuls,
    pad lane dims to 128.

    params: dict with
        w1 (E, D_in, H), b1 (E, H)
        w2 (E, H, H),    b2 (E, H)
        w3 (E, H, O),    b3 (E, O)
    """
    w1, b1 = params["w1"], params["b1"]
    w2, b2 = params["w2"], params["b2"]
    w3, b3 = params["w3"], params["b3"]
    E, d_in, H = w1.shape
    O = w3.shape[-1]
    EH, EO = E * H, E * O

    carrier = EH                       # lane carrying the constant 1.0 between layers
    EH_PAD = _round_up(EH + 1, 128)    # room for the carrier lane, 128-lane aligned
    EO_PAD = _round_up(EO, 128)

    # Layer 1: [x, 1] @ W1aug -> [pre-activation, carrier=1, zeros]
    w1_fold = jnp.transpose(w1, (1, 0, 2)).reshape(d_in, EH)   # column index e*H + h
    w1_aug = jnp.zeros((d_in + 1, EH_PAD), jnp.float32)
    w1_aug = w1_aug.at[:d_in, :EH].set(w1_fold)
    w1_aug = w1_aug.at[d_in, :EH].set(b1.reshape(EH))
    w1_aug = w1_aug.at[d_in, carrier].set(1.0)

    # Layer 2: block-diagonal W2, b2 in the carrier row, carrier lane passthrough.
    w2_aug = jnp.zeros((EH_PAD, EH_PAD), jnp.float32)
    w2_aug = w2_aug.at[:EH, :EH].set(_block_diag(w2))
    w2_aug = w2_aug.at[carrier, :EH].set(b2.reshape(EH))
    w2_aug = w2_aug.at[carrier, carrier].set(1.0)

    # Layer 3: block-diagonal W3, b3 in the carrier row.
    w3_aug = jnp.zeros((EH_PAD, EO_PAD), jnp.float32)
    w3_aug = w3_aug.at[:EH, :EO].set(_block_diag(w3))
    w3_aug = w3_aug.at[carrier, :EO].set(b3.reshape(EO))

    return {"w1": w1_aug, "w2": w2_aug, "w3": w3_aug}


def _ref_forward(state, action, params):
    """Pure-JAX reference (mirrors the PyTorch module) for correctness checking."""
    x = jnp.concatenate([state, action], axis=-1)
    outs = []
    for e in range(params["w1"].shape[0]):
        h = jnp.maximum(x @ params["w1"][e] + params["b1"][e], 0.0)
        h = jnp.maximum(h @ params["w2"][e] + params["b2"][e], 0.0)
        outs.append(h @ params["w3"][e] + params["b3"][e])
    return jnp.stack(outs, axis=1)


def init_params(key, ensemble_size, d_in, hidden, d_out):
    """Deterministic PyTorch-Linear-style init (uniform +-1/sqrt(fan_in))."""
    ks = jax.random.split(key, 6)

    def u(k, shape, fan_in):
        bound = 1.0 / jnp.sqrt(jnp.float32(fan_in))
        return jax.random.uniform(k, shape, jnp.float32, -bound, bound)

    return {
        "w1": u(ks[0], (ensemble_size, d_in, hidden), d_in),
        "b1": u(ks[1], (ensemble_size, hidden), d_in),
        "w2": u(ks[2], (ensemble_size, hidden, hidden), hidden),
        "b2": u(ks[3], (ensemble_size, hidden), hidden),
        "w3": u(ks[4], (ensemble_size, hidden, d_out), hidden),
        "b3": u(ks[5], (ensemble_size, d_out), hidden),
    }


if __name__ == "__main__":
    # Small shapes consistent with the module's forward(state, action).
    B = 8             # batch
    S, A = 12, 4      # state dim, action dim -> input_size = 16
    HIDDEN = 32
    OUT = 1           # output_size (Q-value)
    ENSEMBLE = 3      # ensemble_size

    key = jax.random.PRNGKey(0)
    k_state, k_action, k_params = jax.random.split(key, 3)
    state = jax.random.normal(k_state, (B, S), jnp.float32)
    action = jax.random.normal(k_action, (B, A), jnp.float32)

    stacked_params = init_params(k_params, ENSEMBLE, S + A, HIDDEN, OUT)
    fused_params = fuse_params(stacked_params)       # one-time offline re-layout

    values = ensemble_critic_forward(state, action, fused_params, ENSEMBLE, OUT)
    values = jax.block_until_ready(values)

    ref = _ref_forward(state, action, stacked_params)
    assert values.shape == (B, ENSEMBLE, OUT), values.shape
    assert jnp.allclose(values, ref, atol=1e-5, rtol=1e-5), "mismatch vs reference"

    print("KERNEL_OK")
</pallas_src>

<mosaic_0001>
module attributes {stable_mosaic.version = 11 : i64} {
  func.func @_ensemble_critic_kernel(%arg0: memref<8x17xf32, #tpu.memory_space<vmem>>, %arg1: memref<17x128xf32, #tpu.memory_space<vmem>>, %arg2: memref<128x128xf32, #tpu.memory_space<vmem>>, %arg3: memref<128x128xf32, #tpu.memory_space<vmem>>, %arg4: memref<8x128xf32, #tpu.memory_space<vmem>>) attributes {dimension_semantics = [], scalar_prefetch = 0 : i64, scratch_operands = 0 : i64, tpu.core_type = #tpu.core_type<tc>} {
    %c0 = arith.constant 0 : index
    %c0_0 = arith.constant 0 : index
    %0 = vector.load %arg0[%c0, %c0_0] : memref<8x17xf32, #tpu.memory_space<vmem>>, vector<8x17xf32>
    %c0_1 = arith.constant 0 : index
    %c0_2 = arith.constant 0 : index
    %1 = vector.load %arg1[%c0_1, %c0_2] : memref<17x128xf32, #tpu.memory_space<vmem>>, vector<17x128xf32>
    %cst = arith.constant dense<0.000000e+00> : vector<8x128xf32>
    %2 = tpu.matmul %0, %1, %cst {dimension_numbers = #tpu.dot_dimension_numbers<[1], [0], [0], [1], [0, 0, 1, 1], [], []>} : vector<8x17xf32>, vector<17x128xf32>, vector<8x128xf32> -> vector<8x128xf32>
    %cst_3 = arith.constant 0.000000e+00 : f32
    %3 = vector.broadcast %cst_3 : f32 to vector<8x128xf32>
    %4 = arith.maximumf %2, %3 : vector<8x128xf32>
    %c0_4 = arith.constant 0 : index
    %c0_5 = arith.constant 0 : index
    %5 = vector.load %arg2[%c0_4, %c0_5] : memref<128x128xf32, #tpu.memory_space<vmem>>, vector<128x128xf32>
    %cst_6 = arith.constant dense<0.000000e+00> : vector<8x128xf32>
    %6 = tpu.matmul %4, %5, %cst_6 {dimension_numbers = #tpu.dot_dimension_numbers<[1], [0], [0], [1], [0, 0, 1, 1], [], []>} : vector<8x128xf32>, vector<128x128xf32>, vector<8x128xf32> -> vector<8x128xf32>
    %cst_7 = arith.constant 0.000000e+00 : f32
    %7 = vector.broadcast %cst_7 : f32 to vector<8x128xf32>
    %8 = arith.maximumf %6, %7 : vector<8x128xf32>
    %c0_8 = arith.constant 0 : index
    %c0_9 = arith.constant 0 : index
    %9 = vector.load %arg3[%c0_8, %c0_9] : memref<128x128xf32, #tpu.memory_space<vmem>>, vector<128x128xf32>
    %cst_10 = arith.constant dense<0.000000e+00> : vector<8x128xf32>
    %10 = tpu.matmul %8, %9, %cst_10 {dimension_numbers = #tpu.dot_dimension_numbers<[1], [0], [0], [1], [0, 0, 1, 1], [], []>} : vector<8x128xf32>, vector<128x128xf32>, vector<8x128xf32> -> vector<8x128xf32>
    %c0_11 = arith.constant 0 : index
    %c0_12 = arith.constant 0 : index
    %11 = vector.load %arg4[%c0_11, %c0_12] : memref<8x128xf32, #tpu.memory_space<vmem>>, vector<8x128xf32>
    tpu.vector_store %arg4[%c0_11, %c0_12], %10 {strides = array<i32>} : memref<8x128xf32, #tpu.memory_space<vmem>>, vector<8x128xf32>,
    return
  }
}

</mosaic_0001>

<bundles_post_ra>
// kernel: tpu_custom_call.1
= control target key start
LH: loop header
LB: loop body
LE: loop exit
PB: predicated region body
PF: predicated region fallthrough
CT: control target
= control target key end

     0   :  { %9 = vsyncpa [#allocation3], 0  ;;  %s767_s0 = inlined_call_operand.hbm [shape: f32[8,17], index: 0, kind: input, shape index: {}]   ;;  %s768_s1 = inlined_call_operand.hbm [shape: f32[17,128], index: 1, kind: input, shape index: {}]   ;;  %s769_s2 = inlined_call_operand.hbm [shape: f32[128,128], index: 2, kind: input, shape index: {}]   ;;  %s770_s3 = inlined_call_operand.hbm [shape: f32[128,128], index: 3, kind: input, shape index: {}]   ;;  %s771_s4 = inlined_call_operand.hbm [shape: f32[8,128], index: 4, kind: output, shape index: {}]  }
   0x1   :  { %10 = vsyncpa [#allocation6], 0 }
   0x2   :  { %11 = vsyncpa [#allocation9], 0 }
   0x3   :  { %12 = vsyncpa [#allocation4], 0  ;;  %s643_s15 = smov [#allocation5]   ;;  %s525_s19 = scalar_lea.hbm %s768_s1, 384 }
   0x4   :  { %s28_s16 = sshll.u32 %s643_s15, 4  ;;  %p526_p0 = scmp.ne.s32.totalorder %s768_s1, %s525_s19  ;;  %s29_s16 = int_to_ptr.vmem [resolvable:$true] %s28_s16 }
   0x5   :  { %p529_p1 = scmp.lt.u32.totalorder %s525_s19, %s768_s1 }
   0x7   :  { %p531_p2 = pnand %p529_p1, %p526_p0 }
   0x9   :  { %534 = shalt.err (!%p531_p2)
}
   0xa   :  { %s535_s24 = scalar_lea.vmem %s29_s16, 384  ;;  %p540_p4 = scmp.lt.s32.totalorder %s29_s16, %s29_s16 }
   0xb   :  { %p536_p3 = scmp.ne.s32.totalorder %s29_s16, %s535_s24  ;;  %p541_p5 = scmp.lt.s32.totalorder %s535_s24, %s535_s24 }
   0xd   :  { %p542_p6 = por %p541_p5, %p540_p4 }
   0xf   :  { %p543_p7 = pnand %p542_p6, %p536_p3 }
  0x11   :  { %546 = shalt.err (!%p543_p7)
}
  0x12   :  { %s644_s25 = smov 128   ;;  %s645_s26 = smov 8  }
  0x13   :  { %34 = dma.hbm_to_vmem [thread:$0]  %s768_s1, 384, %s29_s16, [#allocation6], %s644_s25, %s644_s25, %s645_s26  }
  0x14   :  { %s646_s29 = smov [#allocation2]   ;;  %s647_s5 = smov [#allocation7]  }
  0x15   :  { %s19_s30 = sshll.u32 %s646_s29, 4  ;;  %s40_s6 = sshll.u32 %s647_s5, 4  ;;  %s20_s30 = int_to_ptr.vmem [resolvable:$true] %s19_s30  ;;  %s41_s6 = int_to_ptr.vmem [resolvable:$true] %s40_s6 }
  0x16   :  { %s547_s9 = scalar_lea.hbm %s767_s0, 128 }
  0x17   :  { %p548_p8 = scmp.ne.s32.totalorder %s767_s0, %s547_s9  ;;  %p551_p9 = scmp.lt.u32.totalorder %s547_s9, %s767_s0 }
  0x19   :  { %p553_p10 = pnand %p551_p9, %p548_p8 }
  0x1b   :  { %556 = shalt.err (!%p553_p10)
}
  0x1c   :  { %s557_s1 = scalar_lea.vmem %s20_s30, 128  ;;  %p562_p12 = scmp.lt.s32.totalorder %s20_s30, %s20_s30 }
  0x1d   :  { %p558_p11 = scmp.ne.s32.totalorder %s20_s30, %s557_s1  ;;  %p563_p13 = scmp.lt.s32.totalorder %s557_s1, %s557_s1 }
  0x1f   :  { %p564_p0 = por %p563_p13, %p562_p12 }
  0x21   :  { %p565_p1 = pnand %p564_p0, %p558_p11 }
  0x23   :  { %568 = shalt.err (!%p565_p1)
}
  0x24   :  { %22 = dma.hbm_to_vmem [thread:$0]  %s767_s0, 128, %s20_s30, [#allocation3]  }
  0x25   :  { %s569_s18 = scalar_lea.hbm %s769_s2, 2048 }
  0x26   :  { %p570_p2 = scmp.ne.s32.totalorder %s769_s2, %s569_s18  ;;  %p573_p3 = scmp.lt.u32.totalorder %s569_s18, %s769_s2 }
  0x28   :  { %p575_p4 = pnand %p573_p3, %p570_p2 }
  0x2a   :  { %578 = shalt.err (!%p575_p4)
}
  0x2b   :  { %s579_s23 = scalar_lea.vmem %s41_s6, 2048  ;;  %p584_p6 = scmp.lt.s32.totalorder %s41_s6, %s41_s6 }
  0x2c   :  { %p580_p5 = scmp.ne.s32.totalorder %s41_s6, %s579_s23  ;;  %p585_p7 = scmp.lt.s32.totalorder %s579_s23, %s579_s23 }
  0x2e   :  { %p586_p8 = por %p585_p7, %p584_p6 }
  0x30   :  { %p587_p9 = pnand %p586_p8, %p580_p5 }
  0x32   :  { %590 = shalt.err (!%p587_p9)
}
  0x33   :  { %46 = dma.hbm_to_vmem [thread:$0]  %s769_s2, 2048, %s41_s6, [#allocation6], %s644_s25, %s644_s25, %s645_s26  }
  0x34   :  { %s648_s27 = smov [#allocation8]   ;;  %s591_s5 = scalar_lea.hbm %s770_s3, 2048 }
  0x35   :  { %s52_s28 = sshll.u32 %s648_s27, 4  ;;  %p592_p10 = scmp.ne.s32.totalorder %s770_s3, %s591_s5  ;;  %s53_s28 = int_to_ptr.vmem [resolvable:$true] %s52_s28 }
  0x36   :  { %p595_p11 = scmp.lt.u32.totalorder %s591_s5, %s770_s3 }
  0x38   :  { %p597_p12 = pnand %p595_p11, %p592_p10 }
  0x3a   :  { %600 = shalt.err (!%p597_p12)
}
  0x3b   :  { %s601_s11 = scalar_lea.vmem %s53_s28, 2048  ;;  %p606_p0 = scmp.lt.s32.totalorder %s53_s28, %s53_s28 }
  0x3c   :  { %p602_p13 = scmp.ne.s32.totalorder %s53_s28, %s601_s11  ;;  %p607_p1 = scmp.lt.s32.totalorder %s601_s11, %s601_s11 }
  0x3e   :  { %p608_p2 = por %p607_p1, %p606_p0 }
  0x40   :  { %p609_p3 = pnand %p608_p2, %p602_p13 }
  0x42   :  { %612 = shalt.err (!%p609_p3)
}
  0x43   :  { %58 = dma.hbm_to_vmem [thread:$0]  %s770_s3, 2048, %s53_s28, [#allocation9], %s644_s25, %s644_s25, %s645_s26  }
  0x44   :  { %635 = dma.done.wait [#allocation3], 128  }
  0x45   :  { %636 = vsyncadd [#allocation3], 4294967168 }
  0x46   :  { %637 = dma.done.wait [#allocation6], 2432  }
  0x47   :  { %638 = vsyncadd [#allocation6], 4294964864 }
  0x48   :  { %639 = dma.done.wait [#allocation9], 2048  }
  0x49   :  { %640 = vsyncadd [#allocation9], 4294965248  ;;  %v649_v0 = vmov 0.0|0.0   ;;  %vm650_vm0 = vmmov 0   ;;  %v651_v1 = vmov 0.0   ;;  %v72_v2 = vld [vmem:[#allocation5] sm:$0xff] }
  0x4a   :  { %464 = vmatprep.subr.bf16.mxu0 %v649_v0  ;;  %391 = vmatprep.mubr.msk.f32.mxu0 %vm650_vm0, %v651_v1  ;;  %v73_v3 = vld [vmem:[#allocation5 + $0x8] sm:$0xff]  ;;  %v154_v5 = vld [vmem:[#allocation7] sm:$0xff]  ;;  %v155_v6 = vld [vmem:[#allocation7 + $0x8] sm:$0xff]  ;;  %vm79_vm1 = vcmask 1040384   ;;  %vm75_vm2 = vcmask 138240   ;;  %s652_s3 = smov [#allocation10]  }
  0x4b   :  { %467 = vmatprep.subr.bf16.mxu1 %v649_v0  ;;  %426 = vmatprep.mubr.msk.f32.mxu1 %vm650_vm0, %v651_v1  ;;  %v465_v4 = vpack.c.bf16 %v73_v3, %v72_v2  ;;  %v468_v7 = vpack.c.bf16 %v155_v6, %v154_v5  ;;  %v156_v8 = vld [vmem:[#allocation7 + $0x10] sm:$0xff]  ;;  %v157_v9 = vld [vmem:[#allocation7 + $0x18] sm:$0xff]  ;;  %v71_v12 = vld [vmem:[#allocation2] sm:$0xff]  ;;  %s334_s25 = sshll.u32 %s652_s3, 4  ;;  %s335_s25 = int_to_ptr.vmem [resolvable:$true] %s334_s25 }
  0x4c   :  { %v74_v10 = vld [vmem:[#allocation5 + $0x10] sm:$0x1]  ;;  %v471_v11 = vpack.c.bf16 %v157_v9, %v156_v8  ;;  %v158_v13 = vld [vmem:[#allocation7 + $0x20] sm:$0xff]  ;;  %v159_v14 = vld [vmem:[#allocation7 + $0x28] sm:$0xff]  ;;  %s613_s26 = scalar_lea.vmem %s335_s25, 128  ;;  %p618_p5 = scmp.lt.s32.totalorder %s335_s25, %s335_s25 }
  0x4d   :  { %466 = vmatpush3.bf16.msra.mxu0 %v465_v4  ;;  %469 = vmatpush3.bf16.msra.mxu1 %v468_v7  ;;  %v474_v15 = vpack.c.bf16 %v159_v14, %v158_v13  ;;  %v160_v16 = vld [vmem:[#allocation7 + $0x30] sm:$0xff]  ;;  %v161_v17 = vld [vmem:[#allocation7 + $0x38] sm:$0xff]  ;;  %v162_v19 = vld [vmem:[#allocation7 + $0x40] sm:$0xff]  ;;  %p614_p4 = scmp.ne.s32.totalorder %s335_s25, %s613_s26  ;;  %p619_p6 = scmp.lt.s32.totalorder %s613_s26, %s613_s26 }
  0x4e   :  { %389 = vmatprep.subr.mxu0 %v651_v1  ;;  %470 = vmatprep.subr.bf16.mxu1 %v649_v0  ;;  %v477_v18 = vpack.c.bf16 %v161_v17, %v160_v16  ;;  %v163_v20 = vld [vmem:[#allocation7 + $0x48] sm:$0xff]  ;;  %v164_v22 = vld [vmem:[#allocation7 + $0x50] sm:$0xff]  ;;  %v165_v23 = vld [vmem:[#allocation7 + $0x58] sm:$0xff] }
  0x4f   :  { %v480_v21 = vpack.c.bf16 %v163_v20, %v162_v19  ;;  %v483_v24 = vpack.c.bf16 %v165_v23, %v164_v22  ;;  %v166_v25 = vld [vmem:[#allocation7 + $0x60] sm:$0xff]  ;;  %v167_v26 = vld [vmem:[#allocation7 + $0x68] sm:$0xff]  ;;  %v168_v28 = vld [vmem:[#allocation7 + $0x70] sm:$0xff]  ;;  %p620_p7 = por %p619_p6, %p618_p5 }
  0x50   :  { %v486_v27 = vpack.c.bf16 %v167_v26, %v166_v25  ;;  %v169_v29 = vld [vmem:[#allocation7 + $0x78] sm:$0xff]  ;;  %v241_v31 = vld [vmem:[#allocation8] sm:$0xff]  ;;  %v242_v32 = vld [vmem:[#allocation8 + $0x8] sm:$0xff] }
  0x51   :  { %390 = vmatpush3.msk.msra.mxu0 %vm79_vm1, %v74_v10  ;;  %472 = vmatpush3.bf16.msra.mxu1 %v471_v11  ;;  %v489_v30 = vpack.c.bf16 %v169_v29, %v168_v28  ;;  %v243_v33 = vld [vmem:[#allocation8 + $0x10] sm:$0xff]  ;;  %v492_v34 = vpack.c.bf16 %v242_v32, %v241_v31  ;;  %v244_v35 = vld [vmem:[#allocation8 + $0x18] sm:$0xff]  ;;  %v245_v37 = vld [vmem:[#allocation8 + $0x20] sm:$0xff]  ;;  %p621_p8 = pnand %p620_p7, %p614_p4 }
  0x52   :  { %392 = vmatmul.mubr.msk.f32.vlgmr.msra.gmra.mrb[0].mxu0 %vm75_vm2, %v71_v12  ;;  %473 = vmatprep.subr.bf16.mxu1 %v649_v0  ;;  %v495_v36 = vpack.c.bf16 %v244_v35, %v243_v33  ;;  %v246_v38 = vld [vmem:[#allocation8 + $0x28] sm:$0xff]  ;;  %v247_v40 = vld [vmem:[#allocation8 + $0x30] sm:$0xff]  ;;  %v248_v41 = vld [vmem:[#allocation8 + $0x38] sm:$0xff] }
  0x53   :  { %491 = vmatprep.subr.bf16.mxu0 %v649_v0  ;;  %461 = vmatprep.mubr.msk.f32.mxu0 %vm650_vm0, %v651_v1  ;;  %v498_v39 = vpack.c.bf16 %v246_v38, %v245_v37  ;;  %v501_v42 = vpack.c.bf16 %v248_v41, %v247_v40  ;;  %v249_v43 = vld [vmem:[#allocation8 + $0x40] sm:$0xff]  ;;  %v250_v44 = vld [vmem:[#allocation8 + $0x48] sm:$0xff]  ;;  %v251_v46 = vld [vmem:[#allocation8 + $0x50] sm:$0xff] }
  0x54   :  { %493 = vmatpush3.bf16.msra.mxu0 %v492_v34  ;;  %v504_v45 = vpack.c.bf16 %v250_v44, %v249_v43  ;;  %v252_v47 = vld [vmem:[#allocation8 + $0x58] sm:$0xff]  ;;  %v253_v49 = vld [vmem:[#allocation8 + $0x60] sm:$0xff]  ;;  %v254_v50 = vld [vmem:[#allocation8 + $0x68] sm:$0xff] }
  0x55   :  { %475 = vmatpush3.bf16.msra.mxu1 %v474_v15  ;;  %494 = vmatprep.subr.bf16.mxu0 %v649_v0  ;;  %v507_v48 = vpack.c.bf16 %v252_v47, %v251_v46  ;;  %v510_v51 = vpack.c.bf16 %v254_v50, %v253_v49  ;;  %v255_v55 = vld [vmem:[#allocation8 + $0x70] sm:$0xff]  ;;  %v256_v56 = vld [vmem:[#allocation8 + $0x78] sm:$0xff] }
  0x56   :  { %476 = vmatprep.subr.bf16.mxu1 %v649_v0  ;;  %v513_v57 = vpack.c.bf16 %v256_v56, %v255_v55 }
  0x58   :  { %496 = vmatpush3.bf16.msra.mxu0 %v495_v36 }
  0x59   :  { %478 = vmatpush3.bf16.msra.mxu1 %v477_v18  ;;  %497 = vmatprep.subr.bf16.mxu0 %v649_v0 }
  0x5a   :  { %479 = vmatprep.subr.bf16.mxu1 %v649_v0 }
  0x5c   :  { %499 = vmatpush3.bf16.msra.mxu0 %v498_v39 }
  0x5d   :  { %481 = vmatpush3.bf16.msra.mxu1 %v480_v21  ;;  %500 = vmatprep.subr.bf16.mxu0 %v649_v0 }
  0x5e   :  { %482 = vmatprep.subr.bf16.mxu1 %v649_v0 }
  0x60   :  { %502 = vmatpush3.bf16.msra.mxu0 %v501_v42 }
  0x61   :  { %484 = vmatpush3.bf16.msra.mxu1 %v483_v24  ;;  %503 = vmatprep.subr.bf16.mxu0 %v649_v0 }
  0x62   :  { %485 = vmatprep.subr.bf16.mxu1 %v649_v0 }
  0x64   :  { %505 = vmatpush3.bf16.msra.mxu0 %v504_v45 }
  0x65   :  { %487 = vmatpush3.bf16.msra.mxu1 %v486_v27  ;;  %506 = vmatprep.subr.bf16.mxu0 %v649_v0 }
  0x66   :  { %488 = vmatprep.subr.bf16.mxu1 %v649_v0 }
  0x68   :  { %508 = vmatpush3.bf16.msra.mxu0 %v507_v48 }
  0x69   :  { %490 = vmatpush3.bf16.msra.mxu1 %v489_v30  ;;  %509 = vmatprep.subr.bf16.mxu0 %v649_v0 }
  0x6c   :  { %511 = vmatpush3.bf16.msra.mxu0 %v510_v51 }
  0x6d   :  { %512 = vmatprep.subr.bf16.mxu0 %v649_v0 }
  0x70   :  { %514 = vmatpush3.bf16.msra.mxu0 %v513_v57 }
 0x125   :  { %v149_v52 = vpop.f32.mrb[0].mxu0 }
 0x126   :  { %v153_v53 = vmax.f32 %v149_v52, 0.0  ;;  %v393_v54 = vpop.f32.mrb[1].mxu0 }
 0x128   :  { %427 = vmatmul.mubr.f32.vlgmr.msra.gmra.mrb[0].mxu1 %v153_v53 }
 0x1fb   :  { %v236_v58 = vpop.f32.mrb[0].mxu1 }
 0x1fc   :  { %v240_v59 = vmax.f32 %v236_v58, 0.0  ;;  %v428_v60 = vpop.f32.mrb[1].mxu1 }
 0x1fe   :  { %462 = vmatmul.mubr.f32.vlgmr.msra.gmra.mrb[2].mxu0 %v240_v59 }
 0x2d1   :  { %v323_v61 = vpop.f32.mrb[2].mxu0 }
 0x2d2   :  { %327 = vst [vmem:[#allocation10] sm:$0xff] %v323_v61  ;;  %v463_v62 = vpop.f32.mrb[3].mxu0 }
 0x2d3   :  { %624 = shalt.err (!%p621_p8)
}
 0x2d4   :  { %s625_s1 = scalar_lea.hbm %s771_s4, 128 }
 0x2d5   :  { %p626_p9 = scmp.ne.s32.totalorder %s771_s4, %s625_s1  ;;  %p629_p10 = scmp.lt.u32.totalorder %s625_s1, %s771_s4 }
 0x2d7   :  { %p631_p11 = pnand %p629_p10, %p626_p9 }
 0x2d9   :  { %634 = shalt.err (!%p631_p11)
}
 0x2da   :  { %337 = dma.vmem_to_hbm [thread:$0]  %s335_s25, 128, %s771_s4, [#allocation4]  }
 0x2db   :  { %641 = dma.done.wait [#allocation4], 128  }
 0x2dc   :  { %642 = vsyncadd [#allocation4], 4294967168 }
 0x2dd   :  { %341 = vsyncpa [#allocation3], 1 }
 0x2de   :  { %342 = vsyncpa [#allocation6], 1 }
 0x2df   :  { %343 = vsyncpa [#allocation9], 1 }
 0x2e0   :  { %344 = vsyncpa [#allocation4], 1 }

</bundles_post_ra>
